<compile_context>
chip_gen: v7x
topology: tpu7x:2x2x1
jax: 0.10.0
libtpu: 0.0.40
codegen_flags: <defaults>
</compile_context>

<pallas_src>
import jax
import jax.numpy as jnp
from jax.experimental import pallas as pl
from jax.experimental.pallas import tpu as pltpu


# Flat SMEM parameter vector layout (17 scalars, pre-folded on host):
#   [0:8]   0.5 * w1  (4, 2) row-major        -> idx 2*j + k
#   [8:12]  0.5 * b1  (4,)
#   [12:16] 0.25 * w2 (4,)
#   [16]    0.5 * b2 + 0.25 * sum(w2)
_W1_OFF, _B1_OFF, _W2_OFF, _B2_OFF = 0, 8, 12, 16
HIDDEN = 4

_LANE_QUANTUM = 512          # keep tiles a multiple of 512 lanes
_TILE_MAX = 256 * 1024       # max lanes per grid step (~32 MiB VMEM w/ dbl-buffering)


def _round_up(n, m):
    return ((n + m - 1) // m) * m


def _choose_tile_b(B):
    """Adaptive batch tile: tiny tiles for tiny B, big lane-dense tiles for big B."""
    small = _round_up(max(B, 1), _LANE_QUANTUM)
    if small <= 2 * _LANE_QUANTUM:
        # Latency path (e.g. B=8 demo): don't DMA/compute megabytes of padding.
        return small
    # Throughput path: aim for >= ~8 grid steps (pipeline depth + v7x megacore),
    # capped so double-buffered (in, out) tiles stay well under v7x's 64 MiB VMEM.
    tile = _round_up(-(-B // 8), _LANE_QUANTUM)
    return max(_LANE_QUANTUM, min(_TILE_MAX, tile))


def mlp_kernel(params_ref, x_ref, o_ref):
    # x block: (2, TILE_B) f32, batch on the lane axis.
    x = x_ref[...]
    x0 = x[0:1, :]                      # (1, TILE_B)
    x1 = x[1:2, :]                      # (1, TILE_B)

    # Hidden layer, fully unrolled over 4 units.  Weights are pre-halved so
    # tanh(w1h.x + b1h) == tanh(z1/2); the 0.5*t + 0.5 affine of the hidden
    # sigmoid and the /2 of the output sigmoid are folded into w2/b2 on the
    # host, so only the final 0.5*tanh(.) + 0.5 pays extra VALU ops.
    acc = jnp.zeros_like(x0)
    for j in range(HIDDEN):
        zj = (params_ref[_W1_OFF + 2 * j + 0] * x0
              + params_ref[_W1_OFF + 2 * j + 1] * x1
              + params_ref[_B1_OFF + j])
        acc = acc + params_ref[_W2_OFF + j] * jnp.tanh(zj)   # EUP

    o_ref[...] = 0.5 * jnp.tanh(acc + params_ref[_B2_OFF]) + 0.5   # lane-dense store


def _fold_params(w1, b1, w2, b2):
    """Pack the 17 scalars, pre-folding the tanh-sigmoid rewrite into the weights."""
    w1 = w1.astype(jnp.float32)
    b1 = b1.astype(jnp.float32)
    w2 = w2.astype(jnp.float32).reshape(-1)
    b2 = b2.astype(jnp.float32).reshape(-1)
    return jnp.concatenate([
        0.5 * w1.reshape(-1),                 # 8
        0.5 * b1.reshape(-1),                 # 4
        0.25 * w2,                            # 4
        0.5 * b2 + 0.25 * jnp.sum(w2)[None],  # 1
    ])


def mynet_forward_feature_major(x_t, w1, b1, w2, b2, *, tile_b=None):
    """Fast path: x_t is feature-major (2, B) f32 (no wrapper transpose/pad copy
    if B is already a multiple of the chosen tile)."""
    B = x_t.shape[1]
    if tile_b is None:
        tile_b = _choose_tile_b(B)
    nb = pl.cdiv(B, tile_b)
    B_pad = nb * tile_b

    if B_pad != B:
        x_t = jnp.pad(x_t, ((0, 0), (0, B_pad - B)))   # single fused pad op

    params = _fold_params(w1, b1, w2, b2)

    grid_spec = pltpu.PrefetchScalarGridSpec(
        num_scalar_prefetch=1,
        grid=(nb,),
        in_specs=[pl.BlockSpec((2, tile_b), lambda i, p: (0, i))],
        out_specs=pl.BlockSpec((1, tile_b), lambda i, p: (0, i)),
    )

    # Double-buffered (in + out) tiles, 8-sublane padded in VMEM: ~128 * tile_b bytes.
    vmem_limit = min(max(128 * tile_b + (4 << 20), 16 << 20), 48 << 20)

    out = pl.pallas_call(
        mlp_kernel,
        out_shape=jax.ShapeDtypeStruct((1, B_pad), jnp.float32),
        grid_spec=grid_spec,
        compiler_params=pltpu.CompilerParams(
            # Batch tiles are independent -> v7x shards them across its 2 TCs.
            dimension_semantics=("parallel",),
            vmem_limit_bytes=vmem_limit,
        ),
    )(params, x_t)

    return out[0, :B].reshape(B, 1)


def mynet_forward(x, w1, b1, w2, b2, *, tile_b=None):
    """x: (B, 2); w1: (4, 2); b1: (4,); w2: (1, 4); b2: (1,).  Returns (B, 1) f32,
    matching MyNet.forward.  The (B,2)->(2,B) transpose is one fused XLA op;
    producers that can emit feature-major input should call
    mynet_forward_feature_major directly and skip it."""
    x_t = x.astype(jnp.float32).T          # fused transpose (+ pad, if needed, inside)
    return mynet_forward_feature_major(x_t, w1, b1, w2, b2, tile_b=tile_b)


def init_params(key):
    """Deterministic init mirroring PyTorch nn.Linear default (uniform +-1/sqrt(fan_in))."""
    k1, k2, k3, k4 = jax.random.split(key, 4)
    bound1 = 1.0 / jnp.sqrt(2.0)   # fc1 fan_in = 2
    bound2 = 1.0 / jnp.sqrt(4.0)   # fc2 fan_in = 4
    w1 = jax.random.uniform(k1, (4, 2), jnp.float32, -bound1, bound1)
    b1 = jax.random.uniform(k2, (4,), jnp.float32, -bound1, bound1)
    w2 = jax.random.uniform(k3, (1, 4), jnp.float32, -bound2, bound2)
    b2 = jax.random.uniform(k4, (1,), jnp.float32, -bound2, bound2)
    return w1, b1, w2, b2


if __name__ == "__main__":
    key = jax.random.PRNGKey(0)
    kx, kp = jax.random.split(key)
    B = 8
    x = jax.random.normal(kx, (B, 2), jnp.float32)
    w1, b1, w2, b2 = init_params(kp)

    out = jax.block_until_ready(mynet_forward(x, w1, b1, w2, b2))

    # Pure-JAX reference (exact sigmoid).  tanh-based kernel matches closely.
    ref = jax.nn.sigmoid(jax.nn.sigmoid(x @ w1.T + b1) @ w2.T + b2)
    assert out.shape == (B, 1)
    assert jnp.allclose(out, ref, atol=1e-5), "mismatch vs reference"
    print("KERNEL_OK")
</pallas_src>

<mosaic_0001>
module attributes {stable_mosaic.version = 11 : i64} {
  func.func @mlp_kernel(%arg0: i32, %arg1: memref<17xf32, #tpu.memory_space<smem>>, %arg2: memref<2x512xf32, #tpu.memory_space<vmem>>, %arg3: memref<1x512xf32, #tpu.memory_space<vmem>>) attributes {dimension_semantics = [#tpu.dimension_semantics<parallel>], iteration_bounds = array<i64: 1>, scalar_prefetch = 1 : i64, scratch_operands = 0 : i64, tpu.core_type = #tpu.core_type<tc>, window_params = [{transform_indices = @transform_0, window_bounds = array<i64: 2, 512>}, {transform_indices = @transform_1, window_bounds = array<i64: 1, 512>}]} {
    %c0 = arith.constant 0 : index
    %c0_0 = arith.constant 0 : index
    %0 = vector.load %arg2[%c0, %c0_0] : memref<2x512xf32, #tpu.memory_space<vmem>>, vector<2x512xf32>
    %1 = vector.extract_strided_slice %0 {offsets = [0, 0], sizes = [1, 512], strides = [1, 1]} : vector<2x512xf32> to vector<1x512xf32>
    %2 = vector.extract_strided_slice %0 {offsets = [1, 0], sizes = [1, 512], strides = [1, 1]} : vector<2x512xf32> to vector<1x512xf32>
    %cst = arith.constant 0.000000e+00 : f32
    %3 = vector.broadcast %cst : f32 to vector<1x512xf32>
    %c0_1 = arith.constant 0 : index
    %4 = memref.load %arg1[%c0_1] : memref<17xf32, #tpu.memory_space<smem>>
    %5 = vector.broadcast %4 : f32 to vector<1x512xf32>
    %6 = arith.mulf %5, %1 : vector<1x512xf32>
    %c1 = arith.constant 1 : index
    %7 = memref.load %arg1[%c1] : memref<17xf32, #tpu.memory_space<smem>>
    %8 = vector.broadcast %7 : f32 to vector<1x512xf32>
    %9 = arith.mulf %8, %2 : vector<1x512xf32>
    %10 = arith.addf %6, %9 : vector<1x512xf32>
    %c8 = arith.constant 8 : index
    %11 = memref.load %arg1[%c8] : memref<17xf32, #tpu.memory_space<smem>>
    %12 = vector.broadcast %11 : f32 to vector<1x512xf32>
    %13 = arith.addf %10, %12 : vector<1x512xf32>
    %c12 = arith.constant 12 : index
    %14 = memref.load %arg1[%c12] : memref<17xf32, #tpu.memory_space<smem>>
    %15 = math.tanh %13 : vector<1x512xf32>
    %16 = vector.broadcast %14 : f32 to vector<1x512xf32>
    %17 = arith.mulf %16, %15 : vector<1x512xf32>
    %18 = arith.addf %3, %17 : vector<1x512xf32>
    %c2 = arith.constant 2 : index
    %19 = memref.load %arg1[%c2] : memref<17xf32, #tpu.memory_space<smem>>
    %20 = vector.broadcast %19 : f32 to vector<1x512xf32>
    %21 = arith.mulf %20, %1 : vector<1x512xf32>
    %c3 = arith.constant 3 : index
    %22 = memref.load %arg1[%c3] : memref<17xf32, #tpu.memory_space<smem>>
    %23 = vector.broadcast %22 : f32 to vector<1x512xf32>
    %24 = arith.mulf %23, %2 : vector<1x512xf32>
    %25 = arith.addf %21, %24 : vector<1x512xf32>
    %c9 = arith.constant 9 : index
    %26 = memref.load %arg1[%c9] : memref<17xf32, #tpu.memory_space<smem>>
    %27 = vector.broadcast %26 : f32 to vector<1x512xf32>
    %28 = arith.addf %25, %27 : vector<1x512xf32>
    %c13 = arith.constant 13 : index
    %29 = memref.load %arg1[%c13] : memref<17xf32, #tpu.memory_space<smem>>
    %30 = math.tanh %28 : vector<1x512xf32>
    %31 = vector.broadcast %29 : f32 to vector<1x512xf32>
    %32 = arith.mulf %31, %30 : vector<1x512xf32>
    %33 = arith.addf %18, %32 : vector<1x512xf32>
    %c4 = arith.constant 4 : index
    %34 = memref.load %arg1[%c4] : memref<17xf32, #tpu.memory_space<smem>>
    %35 = vector.broadcast %34 : f32 to vector<1x512xf32>
    %36 = arith.mulf %35, %1 : vector<1x512xf32>
    %c5 = arith.constant 5 : index
    %37 = memref.load %arg1[%c5] : memref<17xf32, #tpu.memory_space<smem>>
    %38 = vector.broadcast %37 : f32 to vector<1x512xf32>
    %39 = arith.mulf %38, %2 : vector<1x512xf32>
    %40 = arith.addf %36, %39 : vector<1x512xf32>
    %c10 = arith.constant 10 : index
    %41 = memref.load %arg1[%c10] : memref<17xf32, #tpu.memory_space<smem>>
    %42 = vector.broadcast %41 : f32 to vector<1x512xf32>
    %43 = arith.addf %40, %42 : vector<1x512xf32>
    %c14 = arith.constant 14 : index
    %44 = memref.load %arg1[%c14] : memref<17xf32, #tpu.memory_space<smem>>
    %45 = math.tanh %43 : vector<1x512xf32>
    %46 = vector.broadcast %44 : f32 to vector<1x512xf32>
    %47 = arith.mulf %46, %45 : vector<1x512xf32>
    %48 = arith.addf %33, %47 : vector<1x512xf32>
    %c6 = arith.constant 6 : index
    %49 = memref.load %arg1[%c6] : memref<17xf32, #tpu.memory_space<smem>>
    %50 = vector.broadcast %49 : f32 to vector<1x512xf32>
    %51 = arith.mulf %50, %1 : vector<1x512xf32>
    %c7 = arith.constant 7 : index
    %52 = memref.load %arg1[%c7] : memref<17xf32, #tpu.memory_space<smem>>
    %53 = vector.broadcast %52 : f32 to vector<1x512xf32>
    %54 = arith.mulf %53, %2 : vector<1x512xf32>
    %55 = arith.addf %51, %54 : vector<1x512xf32>
    %c11 = arith.constant 11 : index
    %56 = memref.load %arg1[%c11] : memref<17xf32, #tpu.memory_space<smem>>
    %57 = vector.broadcast %56 : f32 to vector<1x512xf32>
    %58 = arith.addf %55, %57 : vector<1x512xf32>
    %c15 = arith.constant 15 : index
    %59 = memref.load %arg1[%c15] : memref<17xf32, #tpu.memory_space<smem>>
    %60 = math.tanh %58 : vector<1x512xf32>
    %61 = vector.broadcast %59 : f32 to vector<1x512xf32>
    %62 = arith.mulf %61, %60 : vector<1x512xf32>
    %63 = arith.addf %48, %62 : vector<1x512xf32>
    %c16 = arith.constant 16 : index
    %64 = memref.load %arg1[%c16] : memref<17xf32, #tpu.memory_space<smem>>
    %65 = vector.broadcast %64 : f32 to vector<1x512xf32>
    %66 = arith.addf %63, %65 : vector<1x512xf32>
    %67 = math.tanh %66 : vector<1x512xf32>
    %cst_2 = arith.constant 5.000000e-01 : f32
    %68 = vector.broadcast %cst_2 : f32 to vector<1x512xf32>
    %69 = arith.mulf %68, %67 : vector<1x512xf32>
    %cst_3 = arith.constant 5.000000e-01 : f32
    %70 = vector.broadcast %cst_3 : f32 to vector<1x512xf32>
    %71 = arith.addf %69, %70 : vector<1x512xf32>
    %c0_4 = arith.constant 0 : index
    %c0_5 = arith.constant 0 : index
    %72 = vector.load %arg3[%c0_4, %c0_5] : memref<1x512xf32, #tpu.memory_space<vmem>>, vector<1x512xf32>
    tpu.vector_store %arg3[%c0_4, %c0_5], %71 {strides = array<i32>} : memref<1x512xf32, #tpu.memory_space<vmem>>, vector<1x512xf32>,
    return
  }
  func.func @transform_0(%arg0: i32, %arg1: memref<17xf32, #tpu.memory_space<smem>>) -> (i32, i32) {
    %c0_i32 = arith.constant 0 : i32
    %c0_i32_0 = arith.constant 0 : i32
    return %c0_i32, %arg0 : i32, i32
  }
  func.func @transform_1(%arg0: i32, %arg1: memref<17xf32, #tpu.memory_space<smem>>) -> (i32, i32) {
    %c0_i32 = arith.constant 0 : i32
    %c0_i32_0 = arith.constant 0 : i32
    return %c0_i32, %arg0 : i32, i32
  }
}

</mosaic_0001>

<bundles_post_ra>
// kernel: tpu_custom_call.1
= control target key start
LH: loop header
LB: loop body
LE: loop exit
PB: predicated region body
PF: predicated region fallthrough
CT: control target
= control target key end

     0   :  { %s296_s0 = inlined_call_operand.hbm [shape: f32[17], index: 0, kind: input, shape index: {}]   ;;  %s297_s1 = inlined_call_operand.hbm [shape: f32[2,512], index: 1, kind: input, shape index: {}]   ;;  %s298_s2 = inlined_call_operand.hbm [shape: f32[1,512], index: 2, kind: output, shape index: {}]  }
   0x1   :  { %s172_s11 = scalar_lea.hbm %s296_s0, 16 }
   0x2   :  { %p173_p0 = scmp.ne.s32.totalorder %s296_s0, %s172_s11  ;;  %p176_p1 = scmp.lt.u32.totalorder %s172_s11, %s296_s0 }
   0x4   :  { %p178_p2 = pnand %p176_p1, %p173_p0 }
   0x6   :  { %181 = shalt.err (!%p178_p2)  }
   0x7   :  { %s232_s16 = smov [#allocation3]  }
   0x8   :  { %8 = dma.hbm_to_smem %s296_s0, 16, %s232_s16, [#allocation2] }
   0x9   :  { %226 = dma.done.wait [#allocation2], 16 }
   0xa   :  { %227 = vsyncadd [#allocation2], 4294967280 }
   0xb   :  { %10 = sfence }
   0xc   :  { %11 = vsyncpa [#allocation5], 0 }
   0xd   :  { %12 = vsyncpa [#allocation6], 0  ;;  %s233_s19 = smov [#allocation4]   ;;  %s182_s23 = scalar_lea.hbm %s297_s1, 128 }
   0xe   :  { %s19_s20 = sshll.u32 %s233_s19, 4  ;;  %p183_p3 = scmp.ne.s32.totalorder %s297_s1, %s182_s23  ;;  %s20_s20 = int_to_ptr.vmem [resolvable:$true] %s19_s20 }
   0xf   :  { %p186_p4 = scmp.lt.u32.totalorder %s182_s23, %s297_s1 }
  0x11   :  { %p188_p5 = pnand %p186_p4, %p183_p3 }
  0x13   :  { %191 = shalt.err (!%p188_p5)
}
  0x14   :  { %s192_s0 = scalar_lea.vmem %s20_s20, 128  ;;  %p197_p7 = scmp.lt.s32.totalorder %s20_s20, %s20_s20 }
  0x15   :  { %p193_p6 = scmp.ne.s32.totalorder %s20_s20, %s192_s0  ;;  %p198_p8 = scmp.lt.s32.totalorder %s192_s0, %s192_s0 }
  0x17   :  { %p199_p9 = por %p198_p8, %p197_p7 }
  0x19   :  { %p200_p10 = pnand %p199_p9, %p193_p6 }
  0x1b   :  { %203 = shalt.err (!%p200_p10)
}
  0x1c   :  { %22 = dma.hbm_to_vmem [thread:$0]  %s297_s1, 128, %s20_s20, [#allocation5]  }
  0x1d   :  { %228 = dma.done.wait [#allocation5], 128  }
  0x1e   :  { %229 = vsyncadd [#allocation5], 4294967168  ;;  %s27_s30 = sld [smem:[#allocation3]]  ;;  %s138_s3 = sld [smem:[#allocation3 + $0x1]]  ;;  %v26_v0 = vld [vmem:[#allocation4] sm:$0xff]  ;;  %v113_v52 = vlaneseq }
  0x1f   :  { %s275_s4 = sld [smem:[#allocation3 + $0x8]]  ;;  %s142_s5 = sld [smem:[#allocation3 + $0x2]]  ;;  %v234_v50 = vmov 1966171168  }
  0x20   :  { %s143_s6 = sld [smem:[#allocation3 + $0x3]]  ;;  %s277_s7 = sld [smem:[#allocation3 + $0x9]]  ;;  %v111_v51 = vunpack.c.l.s4 %v234_v50  ;;  %v114_v54 = vshrl.u32 %v113_v52, 7  ;;  %vm120_vm0 = vcmp.lt.s32.totalorder %v113_v52, 512 }
  0x21   :  { %s147_s8 = sld [smem:[#allocation3 + $0x4]]  ;;  %s148_s9 = sld [smem:[#allocation3 + $0x5]] }
  0x22   :  { %s279_s10 = sld [smem:[#allocation3 + $0xa]]  ;;  %s152_s11 = sld [smem:[#allocation3 + $0x6]]  ;;  %v112_v53 = vunpack.c.0.s8 %v111_v51 }
  0x23   :  { %s153_s1 = sld [smem:[#allocation3 + $0x7]]  ;;  %s155_s12 = sld [smem:[#allocation3 + $0xb]] }
  0x24   :  { %v28_v1 = vstv %s27_s30  ;;  %v31_v2 = vstv %s138_s3  ;;  %s141_s13 = sld [smem:[#allocation3 + $0xc]]  ;;  %s146_s14 = sld [smem:[#allocation3 + $0xd]]  ;;  %v115_v57 = vsub.s32 %v112_v53, %v114_v54 }
  0x25   :  { %v29_v3 = vmul.f32 %v28_v1, %v26_v0  ;;  %v32_v4 = vmul.f32 %v31_v2, %v26_v0  ;;  %v47_v5 = vstv %s142_s5  ;;  %v39_v10 = vstv %s275_s4  ;;  %s151_s15 = sld [smem:[#allocation3 + $0xe]]  ;;  %s156_s16 = sld [smem:[#allocation3 + $0xf]] }
  0x26   :  { %v50_v6 = vstv %s143_s6  ;;  %v48_v8 = vmul.f32 %v47_v5, %v26_v0  ;;  %v58_v17 = vstv %s277_s7  ;;  %s157_s17 = sld [smem:[#allocation3 + $0x10]]  ;;  %s235_s18 = smov [#allocation7]  }
  0x27   :  { %v139_v7 = vrot.slane %v32_v4, 9  ;;  %v51_v9 = vmul.f32 %v50_v6, %v26_v0  ;;  %v66_v11 = vstv %s147_s8  ;;  %v69_v12 = vstv %s148_s9  ;;  %s129_s19 = sshll.u32 %s235_s18, 4  ;;  %s130_s19 = int_to_ptr.vmem [resolvable:$true] %s129_s19 }
  0x28   :  { %v67_v15 = vmul.f32 %v66_v11, %v26_v0  ;;  %v70_v16 = vmul.f32 %v69_v12, %v26_v0  ;;  %v85_v18 = vstv %s152_s11  ;;  %v77_v23 = vstv %s279_s10  ;;  %s204_s20 = scalar_lea.vmem %s130_s19, 64  ;;  %p209_p12 = scmp.lt.s32.totalorder %s130_s19, %s130_s19 }
  0x29   :  { %v37_v13 = vadd.f32 %v139_v7, %v29_v3  ;;  %v144_v14 = vrot.slane %v51_v9, 9  ;;  %v88_v19 = vstv %s153_s1  ;;  %v86_v24 = vmul.f32 %v85_v18, %v26_v0  ;;  %p205_p11 = scmp.ne.s32.totalorder %s130_s19, %s204_s20  ;;  %p210_p13 = scmp.lt.s32.totalorder %s204_s20, %s204_s20 }
  0x2a   :  { %v149_v22 = vrot.slane %v70_v16, 9  ;;  %v89_v25 = vmul.f32 %v88_v19, %v26_v0  ;;  %v96_v30 = vstv %s155_s12  ;;  %v43_v33 = vstv %s141_s13 }
  0x2b   :  { %v40_v20 = vadd.f32 %v39_v10, %v37_v13  ;;  %v56_v21 = vadd.f32 %v144_v14, %v48_v8  ;;  %v62_v35 = vstv %s146_s14  ;;  %v81_v38 = vstv %s151_s15  ;;  %p211_p0 = por %p210_p13, %p209_p12 }
  0x2c   :  { %v75_v27 = vadd.f32 %v149_v22, %v67_v15  ;;  %v154_v28 = vrot.slane %v89_v25, 9  ;;  %v100_v43 = vstv %s156_s16  ;;  %v104_v47 = vstv %s157_s17 }
  0x2d   :  { %162 = vtanh.f32 %v40_v20  ;;  %v59_v26 = vadd.f32 %v58_v17, %v56_v21  ;;  %p212_p1 = pnand %p211_p0, %p205_p11 }
  0x2e   :  { %v78_v29 = vadd.f32 %v77_v23, %v75_v27  ;;  %v94_v31 = vadd.f32 %v154_v28, %v86_v24 }
  0x2f   :  { %164 = vtanh.f32 %v59_v26 }
  0x30   :  { %166 = vtanh.f32 %v78_v29  ;;  %v97_v32 = vadd.f32 %v96_v30, %v94_v31 }
  0x32   :  { %168 = vtanh.f32 %v97_v32 }
  0x37   :  { %v163_v34 = vpop.eup %162 }
  0x38   :  { %v44_v36 = vmul.f32 %v163_v34, %v43_v33 }
  0x39   :  { %v165_v37 = vpop.eup %164 }
  0x3a   :  { %v63_v39 = vmul.f32 %v165_v37, %v62_v35  ;;  %v167_v40 = vpop.eup %166 }
  0x3b   :  { %v82_v42 = vmul.f32 %v167_v40, %v81_v38 }
  0x3c   :  { %v64_v41 = vadd.f32 %v63_v39, %v44_v36  ;;  %v169_v44 = vpop.eup %168 }
  0x3d   :  { %v101_v46 = vmul.f32 %v169_v44, %v100_v43 }
  0x3e   :  { %v83_v45 = vadd.f32 %v82_v42, %v64_v41 }
  0x40   :  { %v102_v48 = vadd.f32 %v101_v46, %v83_v45 }
  0x42   :  { %v105_v49 = vadd.f32 %v104_v47, %v102_v48 }
  0x44   :  { %170 = vtanh.f32 %v105_v49 }
  0x4e   :  { %v171_v55 = vpop.eup %170 }
  0x4f   :  { %v107_v56 = vmul.f32 0.5, %v171_v55 }
  0x51   :  { %v108_v58 = vadd.f32 0.5, %v107_v56 }
  0x53   :  { %v116_v59 = vrot.slane %v108_v58, %v115_v57 }
  0x55   :  { %122 = vst.msk [vmem:[#allocation7] sm:$0xf] %vm120_vm0, %v116_v59 }
  0x56   :  { %215 = shalt.err (!%p212_p1)
}
  0x57   :  { %s216_s23 = scalar_lea.hbm %s298_s2, 64 }
  0x58   :  { %p217_p2 = scmp.ne.s32.totalorder %s298_s2, %s216_s23  ;;  %p220_p3 = scmp.lt.u32.totalorder %s216_s23, %s298_s2 }
  0x5a   :  { %p222_p4 = pnand %p220_p3, %p217_p2 }
  0x5c   :  { %225 = shalt.err (!%p222_p4)
}
  0x5d   :  { %132 = dma.vmem_to_hbm [thread:$0]  %s130_s19, 64, %s298_s2, [#allocation6]  }
  0x5e   :  { %230 = dma.done.wait [#allocation6], 64  }
  0x5f   :  { %231 = vsyncadd [#allocation6], 4294967232 }
  0x60   :  { %136 = vsyncpa [#allocation5], 1 }
  0x61   :  { %137 = vsyncpa [#allocation6], 1 }

</bundles_post_ra>
